<compile_context>
chip_gen: v5e
topology: v5e:2x2
jax: 0.10.0
libtpu: 0.0.40
codegen_flags: <defaults>
</compile_context>

<pallas_src>
import functools

import jax
import jax.numpy as jnp
from jax.experimental import pallas as pl
from jax.experimental.pallas import tpu as pltpu

_LANE = 128
_SUBLANE = 8
_NEG_INF = -1e9  # bias for padded output logit lanes -> exp() underflows to 0


def _round_up(x, m):
    return (x + m - 1) // m * m


# ----------------------------------------------------------------------------- kernel


def _make_mlp_kernel(padded_widths, bias_offsets):
    """Kernel closed over the (static) layer widths / bias offsets.

    Ref order: x, W_0 ... W_L (BN-folded, padded, (in, out) layout), bias_cat, out.
    """
    num_layers = len(padded_widths)  # hidden layers + output layer

    def kernel(*refs):
        x_ref = refs[0]
        w_refs = refs[1:1 + num_layers]
        b_ref = refs[1 + num_layers]
        out_ref = refs[-1]

        x = x_ref[...]
        for i in range(num_layers):
            off, width = bias_offsets[i], padded_widths[i]
            b = b_ref[:, off:off + width]                      # static slice, (1, width)
            x = jnp.dot(x, w_refs[i][...],
                        preferred_element_type=jnp.float32) + b
            if i < num_layers - 1:
                x = jnp.maximum(x, 0.0)  # ReLU; Dropout in eval mode is identity

        # log_softmax along the feature (lane) axis.  Padded logit lanes carry a
        # -1e9 bias so they contribute nothing to the normalizer.
        m = jnp.max(x, axis=1, keepdims=True)
        shifted = x - m
        lse = jnp.log(jnp.sum(jnp.exp(shifted), axis=1, keepdims=True))
        out_ref[...] = shifted - lse

    return kernel


# ------------------------------------------------------------------- parameter prep


def init_params(key, input_size, output_size, hidden_layers_sizes, eps=1e-5):
    """Deterministic params mirroring the PyTorch module's shapes.

    BatchNorm layers get random gamma/beta/running stats (so the fold is
    non-trivial), pre-reduced to an eval-mode affine (scale, shift)."""
    params = {}
    sizes = [input_size] + list(hidden_layers_sizes)

    def bn_fold(key, feat):
        k1, k2, k3, k4 = jax.random.split(key, 4)
        gamma = 1.0 + 0.1 * jax.random.normal(k1, (feat,), jnp.float32)
        beta = 0.1 * jax.random.normal(k2, (feat,), jnp.float32)
        running_mean = 0.1 * jax.random.normal(k3, (feat,), jnp.float32)
        running_var = 1.0 + 0.1 * jax.random.uniform(k4, (feat,), jnp.float32)
        scale = gamma / jnp.sqrt(running_var + eps)
        shift = beta - running_mean * scale
        return scale.reshape(1, feat), shift.reshape(1, feat)

    keys = jax.random.split(key, 2 * len(hidden_layers_sizes) + 3)
    ki = 0

    params["bn0"] = bn_fold(keys[ki], input_size); ki += 1

    params["hidden"] = []
    for in_sz, out_sz in zip(sizes[:-1], sizes[1:]):
        kw = keys[ki]; ki += 1
        kb, kbn = jax.random.split(kw, 2)
        bound = 1.0 / jnp.sqrt(jnp.float32(in_sz))
        w = jax.random.uniform(kw, (in_sz, out_sz), jnp.float32, -bound, bound)  # (in, out)
        b = jax.random.uniform(kb, (1, out_sz), jnp.float32, -bound, bound)
        bn_s, bn_b = bn_fold(kbn, out_sz)
        params["hidden"].append((w, b, bn_s, bn_b))

    in_sz = hidden_layers_sizes[-1]
    kw = keys[ki]; ki += 1
    kb, _ = jax.random.split(kw, 2)
    bound = 1.0 / jnp.sqrt(jnp.float32(in_sz))
    params["out_w"] = jax.random.uniform(kw, (in_sz, output_size), jnp.float32, -bound, bound)
    params["out_b"] = jax.random.uniform(kb, (1, output_size), jnp.float32, -bound, bound)
    return params


def fold_and_pad(params):
    """Fold every BN affine into the adjacent Linear; pad feature dims to 128 lanes.

    x*s+sh -> @W+b  ==  x @ (diag(s)W) + (sh@W + b), so bn0 folds into layer 0 and
    BN_i (applied after layer i's ReLU) folds into layer i+1 / the output layer.
    Returns (weights_tuple, bias_cat, padded_widths, bias_offsets)."""
    s_prev, sh_prev = params["bn0"]                      # (1, in_features)
    layers = list(params["hidden"]) + [(params["out_w"], params["out_b"], None, None)]

    folded = []
    for (w, b, s, sh) in layers:
        wf = s_prev.reshape(-1, 1) * w                   # diag(s_prev) @ W
        bf = sh_prev @ w + b                             # (1, out)
        folded.append((wf, bf))
        s_prev, sh_prev = s, sh

    padded_weights, padded_biases, padded_widths = [], [], []
    num_layers = len(folded)
    for li, (wf, bf) in enumerate(folded):
        in_f, out_f = wf.shape
        in_pad = in_f if li == 0 else _round_up(in_f, _LANE)
        out_pad = _round_up(out_f, _LANE)
        wp = jnp.zeros((in_pad, out_pad), jnp.float32).at[:in_f, :out_f].set(wf)
        fill = _NEG_INF if li == num_layers - 1 else 0.0
        bp = jnp.full((1, out_pad), fill, jnp.float32).at[:, :out_f].set(bf)
        padded_weights.append(wp)
        padded_biases.append(bp)
        padded_widths.append(out_pad)

    bias_cat = jnp.concatenate(padded_biases, axis=1)    # (1, sum(padded_widths))
    offsets, off = [], 0
    for w_ in padded_widths:
        offsets.append(off)
        off += w_
    return tuple(padded_weights), bias_cat, tuple(padded_widths), tuple(offsets)


# --------------------------------------------------------------------------- forward


@functools.partial(
    jax.jit,
    static_argnames=("output_size", "padded_widths", "bias_offsets", "max_tile_n"))
def mlp_forward(x, weights, bias_cat, *, output_size, padded_widths, bias_offsets,
                max_tile_n=512):
    n, in_feat = x.shape
    out_padded = padded_widths[-1]

    # Batch tiling: pad N to a tile multiple; grid double-buffers x/out HBM<->VMEM.
    tile_n = min(max_tile_n, _round_up(max(n, 1), _SUBLANE))
    n_pad = _round_up(n, tile_n)
    if n_pad != n:
        x = jnp.pad(x, ((0, n_pad - n), (0, 0)))
    grid = (n_pad // tile_n,)

    kernel = _make_mlp_kernel(padded_widths, bias_offsets)

    in_specs = [pl.BlockSpec((tile_n, in_feat), lambda i: (i, 0))]
    for w in weights:  # weights/biases: full-array blocks, resident across grid steps
        in_specs.append(pl.BlockSpec(w.shape, lambda i: (0, 0)))
    in_specs.append(pl.BlockSpec(bias_cat.shape, lambda i: (0, 0)))
    out_specs = pl.BlockSpec((tile_n, out_padded), lambda i: (i, 0))

    flops = 2 * n_pad * sum(int(w.shape[0]) * int(w.shape[1]) for w in weights)
    bytes_accessed = 4 * (n_pad * in_feat + n_pad * out_padded
                          + sum(int(w.size) for w in weights) + int(bias_cat.size))

    out = pl.pallas_call(
        kernel,
        out_shape=jax.ShapeDtypeStruct((n_pad, out_padded), jnp.float32),
        grid=grid,
        in_specs=in_specs,
        out_specs=out_specs,
        compiler_params=pltpu.CompilerParams(dimension_semantics=("parallel",)),
        cost_estimate=pl.CostEstimate(flops=flops,
                                      transcendentals=n_pad * out_padded,
                                      bytes_accessed=bytes_accessed),
    )(x, *weights, bias_cat)

    return out[:n, :output_size]


# --------------------------------------------------------------------------- reference


def reference_forward(x, params):
    """Pure-JAX reference on the UN-folded params (mirrors the PyTorch forward)."""
    s, sh = params["bn0"]
    x = x * s + sh
    for (w, b, bs, bsh) in params["hidden"]:
        x = jnp.maximum(x @ w + b, 0.0)     # Linear -> ReLU -> Dropout(eval) = identity
        x = x * bs + bsh                     # BatchNorm1d (eval affine)
    x = x @ params["out_w"] + params["out_b"]
    return jax.nn.log_softmax(x, axis=1)


if __name__ == "__main__":
    # Shapes consistent with the module: input=32, hidden=[64, 48], output=16.
    input_size = 32
    output_size = 16
    hidden_layers_sizes = [64, 48]

    key = jax.random.PRNGKey(0)
    kx, kp, kx2 = jax.random.split(key, 3)
    params = init_params(kp, input_size, output_size, hidden_layers_sizes)
    weights, bias_cat, padded_widths, bias_offsets = fold_and_pad(params)

    # --- small batch (latency-bound regime) ---
    x = jax.random.normal(kx, (8, input_size), jnp.float32)
    out = mlp_forward(x, weights, bias_cat, output_size=output_size,
                      padded_widths=padded_widths, bias_offsets=bias_offsets)
    out = jax.block_until_ready(out)
    ref = reference_forward(x, params)
    assert out.shape == (8, output_size)
    assert jnp.allclose(out, ref, atol=1e-3, rtol=1e-3), "mismatch vs JAX reference (batch=8)"
    assert jnp.allclose(jnp.sum(jnp.exp(out), axis=1), 1.0, atol=1e-4)

    # --- larger, non-aligned batch to exercise the grid + row padding path ---
    x2 = jax.random.normal(kx2, (640, input_size), jnp.float32)
    out2 = mlp_forward(x2, weights, bias_cat, output_size=output_size,
                       padded_widths=padded_widths, bias_offsets=bias_offsets,
                       max_tile_n=256)   # -> grid of 3 batch tiles
    out2 = jax.block_until_ready(out2)
    ref2 = reference_forward(x2, params)
    assert out2.shape == (640, output_size)
    assert jnp.allclose(out2, ref2, atol=1e-3, rtol=1e-3), "mismatch vs JAX reference (batch=640)"
    assert jnp.allclose(jnp.sum(jnp.exp(out2), axis=1), 1.0, atol=1e-4)

    print("KERNEL_OK")
</pallas_src>

<mosaic_0001>
module attributes {stable_mosaic.version = 11 : i64} {
  func.func @kernel(%arg0: i32, %arg1: memref<8x32xf32, #tpu.memory_space<vmem>>, %arg2: memref<32x128xf32, #tpu.memory_space<vmem>>, %arg3: memref<128x128xf32, #tpu.memory_space<vmem>>, %arg4: memref<128x128xf32, #tpu.memory_space<vmem>>, %arg5: memref<1x384xf32, #tpu.memory_space<vmem>>, %arg6: memref<8x128xf32, #tpu.memory_space<vmem>>) attributes {dimension_semantics = [#tpu.dimension_semantics<parallel>], iteration_bounds = array<i64: 1>, scalar_prefetch = 0 : i64, scratch_operands = 0 : i64, tpu.core_type = #tpu.core_type<tc>, window_params = [{transform_indices = @transform_0, window_bounds = array<i64: 8, 32>}, {pipeline_mode = #tpu.pipeline_mode<synchronous>, transform_indices = @transform_1, window_bounds = array<i64: 32, 128>}, {pipeline_mode = #tpu.pipeline_mode<synchronous>, transform_indices = @transform_2, window_bounds = array<i64: 128, 128>}, {pipeline_mode = #tpu.pipeline_mode<synchronous>, transform_indices = @transform_3, window_bounds = array<i64: 128, 128>}, {pipeline_mode = #tpu.pipeline_mode<synchronous>, transform_indices = @transform_4, window_bounds = array<i64: 1, 384>}, {transform_indices = @transform_5, window_bounds = array<i64: 8, 128>}]} {
    %c0 = arith.constant 0 : index
    %c0_0 = arith.constant 0 : index
    %0 = vector.load %arg1[%c0, %c0_0] : memref<8x32xf32, #tpu.memory_space<vmem>>, vector<8x32xf32>
    %c0_1 = arith.constant 0 : index
    %c0_2 = arith.constant 0 : index
    %1 = vector.load %arg5[%c0_1, %c0_2] : memref<1x384xf32, #tpu.memory_space<vmem>>, vector<1x128xf32>
    %c0_3 = arith.constant 0 : index
    %c0_4 = arith.constant 0 : index
    %2 = vector.load %arg2[%c0_3, %c0_4] : memref<32x128xf32, #tpu.memory_space<vmem>>, vector<32x128xf32>
    %cst = arith.constant dense<0.000000e+00> : vector<8x128xf32>
    %3 = tpu.matmul %0, %2, %cst {dimension_numbers = #tpu.dot_dimension_numbers<[1], [0], [0], [1], [0, 0, 1, 1], [], []>} : vector<8x32xf32>, vector<32x128xf32>, vector<8x128xf32> -> vector<8x128xf32>
    %4 = vector.broadcast %1 : vector<1x128xf32> to vector<8x128xf32>
    %5 = arith.addf %3, %4 : vector<8x128xf32>
    %cst_5 = arith.constant 0.000000e+00 : f32
    %6 = vector.broadcast %cst_5 : f32 to vector<8x128xf32>
    %7 = arith.maximumf %5, %6 : vector<8x128xf32>
    %c0_6 = arith.constant 0 : index
    %c128 = arith.constant 128 : index
    %8 = vector.load %arg5[%c0_6, %c128] : memref<1x384xf32, #tpu.memory_space<vmem>>, vector<1x128xf32>
    %c0_7 = arith.constant 0 : index
    %c0_8 = arith.constant 0 : index
    %9 = vector.load %arg3[%c0_7, %c0_8] : memref<128x128xf32, #tpu.memory_space<vmem>>, vector<128x128xf32>
    %cst_9 = arith.constant dense<0.000000e+00> : vector<8x128xf32>
    %10 = tpu.matmul %7, %9, %cst_9 {dimension_numbers = #tpu.dot_dimension_numbers<[1], [0], [0], [1], [0, 0, 1, 1], [], []>} : vector<8x128xf32>, vector<128x128xf32>, vector<8x128xf32> -> vector<8x128xf32>
    %11 = vector.broadcast %8 : vector<1x128xf32> to vector<8x128xf32>
    %12 = arith.addf %10, %11 : vector<8x128xf32>
    %cst_10 = arith.constant 0.000000e+00 : f32
    %13 = vector.broadcast %cst_10 : f32 to vector<8x128xf32>
    %14 = arith.maximumf %12, %13 : vector<8x128xf32>
    %c0_11 = arith.constant 0 : index
    %c256 = arith.constant 256 : index
    %15 = vector.load %arg5[%c0_11, %c256] : memref<1x384xf32, #tpu.memory_space<vmem>>, vector<1x128xf32>
    %c0_12 = arith.constant 0 : index
    %c0_13 = arith.constant 0 : index
    %16 = vector.load %arg4[%c0_12, %c0_13] : memref<128x128xf32, #tpu.memory_space<vmem>>, vector<128x128xf32>
    %cst_14 = arith.constant dense<0.000000e+00> : vector<8x128xf32>
    %17 = tpu.matmul %14, %16, %cst_14 {dimension_numbers = #tpu.dot_dimension_numbers<[1], [0], [0], [1], [0, 0, 1, 1], [], []>} : vector<8x128xf32>, vector<128x128xf32>, vector<8x128xf32> -> vector<8x128xf32>
    %18 = vector.broadcast %15 : vector<1x128xf32> to vector<8x128xf32>
    %19 = arith.addf %17, %18 : vector<8x128xf32>
    %cst_15 = arith.constant dense<0xFF800000> : vector<8xf32>
    %20 = vector.multi_reduction <maximumf>, %19, %cst_15 [1] : vector<8x128xf32> to vector<8xf32>
    %21 = vector.shape_cast %20 : vector<8xf32> to vector<8x1xf32>
    %22 = vector.broadcast %21 : vector<8x1xf32> to vector<8x128xf32>
    %23 = arith.subf %19, %22 : vector<8x128xf32>
    %24 = math.exp %23 : vector<8x128xf32>
    %cst_16 = arith.constant dense<0.000000e+00> : vector<8xf32>
    %25 = vector.multi_reduction <add>, %24, %cst_16 [1] : vector<8x128xf32> to vector<8xf32>
    %26 = vector.shape_cast %25 : vector<8xf32> to vector<8x1xf32>
    %27 = math.log %26 : vector<8x1xf32>
    %28 = vector.broadcast %27 : vector<8x1xf32> to vector<8x128xf32>
    %29 = arith.subf %23, %28 : vector<8x128xf32>
    %c0_17 = arith.constant 0 : index
    %c0_18 = arith.constant 0 : index
    %30 = vector.load %arg6[%c0_17, %c0_18] : memref<8x128xf32, #tpu.memory_space<vmem>>, vector<8x128xf32>
    tpu.vector_store %arg6[%c0_17, %c0_18], %29 {strides = array<i32>} : memref<8x128xf32, #tpu.memory_space<vmem>>, vector<8x128xf32>,
    return
  }
  func.func @transform_0(%arg0: i32) -> (i32, i32) {
    %c0_i32 = arith.constant 0 : i32
    %c0_i32_0 = arith.constant 0 : i32
    return %arg0, %c0_i32 : i32, i32
  }
  func.func @transform_1(%arg0: i32) -> (i32, i32) {
    %c0_i32 = arith.constant 0 : i32
    %c0_i32_0 = arith.constant 0 : i32
    %c0_i32_1 = arith.constant 0 : i32
    return %c0_i32, %c0_i32_0 : i32, i32
  }
  func.func @transform_2(%arg0: i32) -> (i32, i32) {
    %c0_i32 = arith.constant 0 : i32
    %c0_i32_0 = arith.constant 0 : i32
    %c0_i32_1 = arith.constant 0 : i32
    return %c0_i32, %c0_i32_0 : i32, i32
  }
  func.func @transform_3(%arg0: i32) -> (i32, i32) {
    %c0_i32 = arith.constant 0 : i32
    %c0_i32_0 = arith.constant 0 : i32
    %c0_i32_1 = arith.constant 0 : i32
    return %c0_i32, %c0_i32_0 : i32, i32
  }
  func.func @transform_4(%arg0: i32) -> (i32, i32) {
    %c0_i32 = arith.constant 0 : i32
    %c0_i32_0 = arith.constant 0 : i32
    %c0_i32_1 = arith.constant 0 : i32
    return %c0_i32, %c0_i32_0 : i32, i32
  }
  func.func @transform_5(%arg0: i32) -> (i32, i32) {
    %c0_i32 = arith.constant 0 : i32
    %c0_i32_0 = arith.constant 0 : i32
    return %arg0, %c0_i32 : i32, i32
  }
}

</mosaic_0001>

<bundles_post_ra>
// kernel: mlp_forward.1
= control target key start
LH: loop header
LB: loop body
LE: loop exit
PB: predicated region body
PF: predicated region fallthrough
CT: control target
= control target key end

     0   :  { %10 = vsyncpa [#allocation3], 0  ;;  %s431_s0 = inlined_call_operand.hbm [shape: f32[8,32], index: 0, kind: input, shape index: {}]   ;;  %s432_s1 = inlined_call_operand.hbm [shape: f32[32,128], index: 1, kind: input, shape index: {}]   ;;  %s433_s2 = inlined_call_operand.hbm [shape: f32[128,128], index: 2, kind: input, shape index: {}]   ;;  %s434_s3 = inlined_call_operand.hbm [shape: f32[128,128], index: 3, kind: input, shape index: {}]   ;;  %s435_s4 = inlined_call_operand.vmem [shape: f32[1,384], index: 4, kind: input, shape index: {}]   ;;  %s436_s5 = inlined_call_operand.hbm [shape: f32[8,128], index: 5, kind: output, shape index: {}]  }
   0x1   :  { %11 = vsyncpa [#allocation6], 0 }
   0x2   :  { %12 = vsyncpa [#allocation9], 0  ;;  %s29_s20 = sshll.u32 %s432_s1, 4  ;;  %s30_s20 = int_to_ptr.hbm [resolvable:$true] %s29_s20 }
   0x3   :  { %13 = vsyncpa [#allocation4], 0  ;;  %s370_s21 = smov [#allocation5]   ;;  %s19_s25 = sshll.u32 %s431_s0, 4  ;;  %s20_s25 = int_to_ptr.hbm [resolvable:$true] %s19_s25 }
   0x4   :  { %s31_s22 = sshll.u32 %s370_s21, 4  ;;  %s371_s26 = smov 128   ;;  %s32_s22 = int_to_ptr.vmem [resolvable:$true] %s31_s22 }
   0x5   :  { %s372_s27 = smov 8   ;;  %s373_s28 = smov [#allocation2]  }
   0x6   :  { %37 = dma.hbm_to_vmem [thread:$0]  %s30_s20, 512, %s32_s22, [#allocation6], %s371_s26, %s371_s26, %s372_s27  }
   0x7   :  { %s21_s29 = sshll.u32 %s373_s28, 4  ;;  %s42_s7 = sshll.u32 %s433_s2, 4  ;;  %s22_s29 = int_to_ptr.vmem [resolvable:$true] %s21_s29  ;;  %s43_s7 = int_to_ptr.hbm [resolvable:$true] %s42_s7 }
   0x8   :  { %24 = dma.hbm_to_vmem [thread:$0]  %s20_s25, 128, %s22_s29, [#allocation3]  }
   0x9   :  { %s55_s9 = sshll.u32 %s434_s3, 4  ;;  %s374_s10 = smov [#allocation7]   ;;  %s56_s9 = int_to_ptr.hbm [resolvable:$true] %s55_s9 }
   0xa   :  { %s44_s11 = sshll.u32 %s374_s10, 4  ;;  %s375_s0 = smov [#allocation8]   ;;  %s45_s11 = int_to_ptr.vmem [resolvable:$true] %s44_s11 }
   0xb   :  { %50 = dma.hbm_to_vmem [thread:$0]  %s43_s7, 2048, %s45_s11, [#allocation6], %s371_s26, %s371_s26, %s372_s27  }
   0xc   :  { %s57_s12 = sshll.u32 %s375_s0, 4  ;;  %s58_s12 = int_to_ptr.vmem [resolvable:$true] %s57_s12 }
   0xd   :  { %63 = dma.hbm_to_vmem [thread:$0]  %s56_s9, 2048, %s58_s12, [#allocation9], %s371_s26, %s371_s26, %s372_s27  }
   0xe   :  { %362 = dma.done.wait [#allocation3], 128  }
   0xf   :  { %363 = vsyncadd [#allocation3], 4294967168 }
  0x10   :  { %364 = dma.done.wait [#allocation6], 2560  }
  0x11   :  { %365 = vsyncadd [#allocation6], 4294964736 }
  0x12   :  { %366 = dma.done.wait [#allocation9], 2048  }
  0x13   :  { %367 = vsyncadd [#allocation9], 4294965248  ;;  %v87_v0 = vld [vmem:[#allocation5 + $0x18] sm:$0xff]  ;;  %v86_v1 = vld [vmem:[#allocation5 + $0x10] sm:$0xff]  ;;  %vm91_vm0 = vcmask 261120   ;;  %s376_s17 = smov [#allocation10]  }
  0x14   :  { %107 = vmatpush.msra.mxu0 %v87_v0  ;;  %v132_v2 = vld [vmem:[#allocation7 + $0x78] sm:$0xff]  ;;  %v85_v3 = vld [vmem:[#allocation5 + $0x8] sm:$0xff]  ;;  %v131_v4 = vld [vmem:[#allocation7 + $0x70] sm:$0xff]  ;;  %s213_s18 = sshll.u32 %s376_s17, 4  ;;  %s215_s21 = sshll.u32 %s436_s5, 4  ;;  %s214_s18 = int_to_ptr.vmem [resolvable:$true] %s213_s18  ;;  %s216_s21 = int_to_ptr.hbm [resolvable:$true] %s215_s21 }
  0x15   :  { %136 = vmatpush.msra.mxu1 %v132_v2  ;;  %v130_v5 = vld [vmem:[#allocation7 + $0x68] sm:$0xff]  ;;  %v84_v6 = vld [vmem:[#allocation5] sm:$0xff]  ;;  %v82_v7 = vld [vmem:[#allocation2] sm:$0xff] }
  0x16   :  { %108 = vmatpush.msra.mxu0 %v86_v1  ;;  %v129_v8 = vld [vmem:[#allocation7 + $0x60] sm:$0xff]  ;;  %v128_v9 = vld [vmem:[#allocation7 + $0x58] sm:$0xff]  ;;  %v127_v10 = vld [vmem:[#allocation7 + $0x50] sm:$0xff] }
  0x17   :  { %137 = vmatpush.msra.mxu1 %v131_v4  ;;  %v126_v11 = vld [vmem:[#allocation7 + $0x48] sm:$0xff]  ;;  %v125_v12 = vld [vmem:[#allocation7 + $0x40] sm:$0xff]  ;;  %v124_v13 = vld [vmem:[#allocation7 + $0x38] sm:$0xff] }
  0x18   :  { %109 = vmatpush.msra.mxu0 %v85_v3  ;;  %v123_v14 = vld [vmem:[#allocation7 + $0x30] sm:$0xff]  ;;  %v122_v15 = vld [vmem:[#allocation7 + $0x28] sm:$0xff]  ;;  %v121_v16 = vld [vmem:[#allocation7 + $0x20] sm:$0xff] }
  0x19   :  { %138 = vmatpush.msra.mxu1 %v130_v5  ;;  %v120_v17 = vld [vmem:[#allocation7 + $0x18] sm:$0xff]  ;;  %v119_v18 = vld [vmem:[#allocation7 + $0x10] sm:$0xff]  ;;  %v118_v19 = vld [vmem:[#allocation7 + $0x8] sm:$0xff] }
  0x1a   :  { %110 = vmatpush.msra.mxu0 %v84_v6  ;;  %v117_v20 = vld [vmem:[#allocation7] sm:$0xff]  ;;  %v173_v21 = vld [vmem:[#allocation8 + $0x78] sm:$0xff]  ;;  %v172_v22 = vld [vmem:[#allocation8 + $0x70] sm:$0xff] }
  0x1b   :  { %227 = vmatmul.msk.f32.vlgmr.msra.gmra.mxu0 %vm91_vm0, %v82_v7  ;;  %139 = vmatpush.msra.mxu1 %v129_v8  ;;  %v171_v23 = vld [vmem:[#allocation8 + $0x68] sm:$0xff]  ;;  %v170_v24 = vld [vmem:[#allocation8 + $0x60] sm:$0xff]  ;;  %v169_v25 = vld [vmem:[#allocation8 + $0x58] sm:$0xff] }
  0x1c   :  { %177 = vmatpush.msra.mxu2 %v173_v21  ;;  %v168_v26 = vld [vmem:[#allocation8 + $0x50] sm:$0xff]  ;;  %v167_v27 = vld [vmem:[#allocation8 + $0x48] sm:$0xff]  ;;  %v166_v28 = vld [vmem:[#allocation8 + $0x40] sm:$0xff] }
  0x1d   :  { %140 = vmatpush.msra.mxu1 %v128_v9  ;;  %v165_v29 = vld [vmem:[#allocation8 + $0x38] sm:$0xff]  ;;  %v164_v30 = vld [vmem:[#allocation8 + $0x30] sm:$0xff]  ;;  %v163_v31 = vld [vmem:[#allocation8 + $0x28] sm:$0xff] }
  0x1e   :  { %178 = vmatpush.msra.mxu2 %v172_v22  ;;  %v162_v32 = vld [vmem:[#allocation8 + $0x20] sm:$0xff]  ;;  %v161_v33 = vld [vmem:[#allocation8 + $0x18] sm:$0xff]  ;;  %v160_v38 = vld [vmem:[#allocation8 + $0x10] sm:$0xff] }
  0x1f   :  { %141 = vmatpush.msra.mxu1 %v127_v10  ;;  %v235_v34 = vld [vmem:[%s435_s4] ss:$0 sm:$0xff]  ;;  %v159_v39 = vld [vmem:[#allocation8 + $0x8] sm:$0xff]  ;;  %v158_v40 = vld [vmem:[#allocation8] sm:$0xff] }
  0x20   :  { %179 = vmatpush.msra.mxu2 %v171_v23  ;;  %v236_v41 = vld [vmem:[%s435_s4 + $0x1] ss:$0 sm:$0xff]  ;;  %v237_v45 = vld [vmem:[%s435_s4 + $0x2] ss:$0 sm:$0xff] }
  0x21   :  { %142 = vmatpush.msra.mxu1 %v126_v11 }
  0x22   :  { %180 = vmatpush.msra.mxu2 %v170_v24 }
  0x23   :  { %143 = vmatpush.msra.mxu1 %v125_v12 }
  0x24   :  { %181 = vmatpush.msra.mxu2 %v169_v25 }
  0x25   :  { %144 = vmatpush.msra.mxu1 %v124_v13 }
  0x26   :  { %182 = vmatpush.msra.mxu2 %v168_v26 }
  0x27   :  { %145 = vmatpush.msra.mxu1 %v123_v14 }
  0x28   :  { %183 = vmatpush.msra.mxu2 %v167_v27 }
  0x29   :  { %146 = vmatpush.msra.mxu1 %v122_v15 }
  0x2a   :  { %184 = vmatpush.msra.mxu2 %v166_v28 }
  0x2b   :  { %147 = vmatpush.msra.mxu1 %v121_v16 }
  0x2c   :  { %185 = vmatpush.msra.mxu2 %v165_v29 }
  0x2d   :  { %148 = vmatpush.msra.mxu1 %v120_v17 }
  0x2e   :  { %186 = vmatpush.msra.mxu2 %v164_v30 }
  0x2f   :  { %149 = vmatpush.msra.mxu1 %v119_v18 }
  0x30   :  { %187 = vmatpush.msra.mxu2 %v163_v31 }
  0x31   :  { %150 = vmatpush.msra.mxu1 %v118_v19 }
  0x32   :  { %188 = vmatpush.msra.mxu2 %v162_v32 }
  0x33   :  { %151 = vmatpush.msra.mxu1 %v117_v20 }
  0x34   :  { %189 = vmatpush.msra.mxu2 %v161_v33 }
  0x36   :  { %190 = vmatpush.msra.mxu2 %v160_v38 }
  0x38   :  { %191 = vmatpush.msra.mxu2 %v159_v39 }
  0x3a   :  { %192 = vmatpush.msra.mxu2 %v158_v40 }
  0x98   :  { %v112_v35 = vpop.f32.mrf.mxu0 }
  0x99   :  { %v113_v36 = vadd.f32 %v235_v34, %v112_v35 }
  0x9b   :  { %v115_v37 = vmax.f32 %v113_v36, 0.0 }
  0x9d   :  { %152 = vmatmul.f32.vlgmr.msra.gmra.mxu1 %v115_v37 }
 0x11a   :  { %v153_v42 = vpop.f32.mrf.mxu1 }
 0x11b   :  { %v154_v43 = vadd.f32 %v236_v41, %v153_v42 }
 0x11d   :  { %v156_v44 = vmax.f32 %v154_v43, 0.0 }
 0x11f   :  { %193 = vmatmul.f32.vlgmr.msra.gmra.mxu2 %v156_v44 }
 0x1a2   :  { %v194_v46 = vpop.f32.mrf.mxu2 }
 0x1a3   :  { %v195_v47 = vadd.f32 %v237_v45, %v194_v46 }
 0x1a5   :  { %197 = vmax.xlane.f32.xlu0 %v195_v47 }
 0x218   :  { %v198_v48 = vpop.xlane.xlu0 %197 }
 0x219   :  { %v199_v49 = vsub.f32 %v195_v47, %v198_v48 }
 0x21b   :  { %v200_v50 = vmul.f32 1.442695, %v199_v49 }
 0x21d   :  { %238 = vpow2.f32 %v200_v50 }
 0x223   :  { %v239_v51 = vpop.eup %238 }
 0x224   :  { %202 = vadd.xlane.f32.xlu0 %v239_v51 }
 0x297   :  { %v203_v52 = vpop.xlane.xlu0 %202 }
 0x298   :  { %240 = vlog2.f32 %v203_v52 }
 0x29e   :  { %v241_v53 = vpop.eup %240 }
 0x29f   :  { %v205_v54 = vmul.f32 0.6931472, %v241_v53 }
 0x2a1   :  { %v206_v55 = vsub.f32 %v199_v49, %v205_v54 }
 0x2a3   :  { %207 = vst [vmem:[#allocation10] sm:$0xff] %v206_v55 }
 0x2a4   :  { %218 = dma.vmem_to_hbm [thread:$0]  %s214_s18, 128, %s216_s21, [#allocation4]  }
 0x2a5   :  { %368 = dma.done.wait [#allocation4], 128  }
 0x2a6   :  { %369 = vsyncadd [#allocation4], 4294967168 }
 0x2a7   :  { %223 = vsyncpa [#allocation3], 1 }
 0x2a8   :  { %224 = vsyncpa [#allocation6], 1 }
 0x2a9   :  { %225 = vsyncpa [#allocation9], 1 }
 0x2aa   :  { %226 = vsyncpa [#allocation4], 1 }

</bundles_post_ra>
